<compile_context>
chip_gen: v6e
topology: v6e:2x2x1
jax: 0.10.0
libtpu: 0.0.40
codegen_flags: <defaults>
</compile_context>

<pallas_src>
import jax
import jax.numpy as jnp
from jax.experimental import pallas as pl
from jax.experimental.pallas import tpu as pltpu


def _dma_copy_kernel(x_hbm_ref, o_hbm_ref, sem):
    # Single HBM->HBM async copy of the full array; bit-exact identity.
    cp = pltpu.make_async_copy(x_hbm_ref, o_hbm_ref, sem)
    cp.start()
    cp.wait()


def no_embedding_forward(x, real_lengths=None, *, materialize=False):
    """Pallas implementation of NoEmbedding.forward: returns x unchanged.

    real_lengths is accepted for API parity and ignored (matches PyTorch).

    materialize=False (default): the identity is free — x is returned as-is.
    materialize=True: a single HBM->HBM DMA produces a *distinct* output
    buffer with identical contents (2*size bytes of HBM traffic, the minimum
    possible for a real copy). No input/output aliasing is used, so there is
    no hidden defensive copy and the output is guaranteed to be a separate
    buffer regardless of donation.
    """
    if not materialize:
        return x

    if x.size == 0:
        return x  # nothing to copy

    itemsize = jnp.dtype(x.dtype).itemsize

    return pl.pallas_call(
        _dma_copy_kernel,
        out_shape=jax.ShapeDtypeStruct(x.shape, x.dtype),
        # Leave both operands in place (HBM); the kernel drives the DMA.
        in_specs=[pl.BlockSpec(memory_space=pl.ANY)],
        out_specs=pl.BlockSpec(memory_space=pl.ANY),
        scratch_shapes=[pltpu.SemaphoreType.DMA(())],
        # Advisory: pure bandwidth op (read + write), zero compute — lets XLA
        # overlap it with neighboring compute in real pipelines.
        cost_estimate=pl.CostEstimate(
            flops=0,
            transcendentals=0,
            bytes_accessed=2 * x.size * itemsize,
        ),
    )(x)


if __name__ == "__main__":
    key = jax.random.PRNGKey(0)
    # Small shapes consistent with an embedding-layer input: (batch, seq, hidden)
    B, S, H = 2, 8, 32
    x = jax.random.normal(key, (B, S, H), dtype=jnp.float32)

    # Default path: true identity, no kernel launched.
    y_fast = no_embedding_forward(x, real_lengths=None)
    assert y_fast is x

    # Materialized path: single HBM->HBM DMA into a distinct output buffer.
    y = no_embedding_forward(x, real_lengths=None, materialize=True)
    y = jax.block_until_ready(y)

    assert y.shape == x.shape, (y.shape, x.shape)
    assert y.dtype == x.dtype, (y.dtype, x.dtype)
    assert bool(jnp.all(y == x)), "identity mismatch"

    # Also exercise a non-f32 dtype to confirm the DMA path is shape/dtype
    # agnostic (no tiling constraints to violate).
    xb = jax.random.normal(jax.random.PRNGKey(1), (B, S, H)).astype(jnp.bfloat16)
    yb = jax.block_until_ready(
        no_embedding_forward(xb, real_lengths=None, materialize=True)
    )
    assert bool(jnp.all(yb == xb)), "identity mismatch (bf16)"

    print("KERNEL_OK")
</pallas_src>

<mosaic_0001>
module attributes {stable_mosaic.version = 11 : i64} {
  func.func @_dma_copy_kernel(%arg0: memref<2x8x32xf32, #tpu.memory_space<any>>, %arg1: memref<2x8x32xf32, #tpu.memory_space<any>>, %arg2: memref<!tpu.dma_semaphore, #tpu.memory_space<semaphore_mem>>) attributes {dimension_semantics = [], scalar_prefetch = 0 : i64, scratch_operands = 1 : i64, tpu.core_type = #tpu.core_type<tc>} {
    tpu.enqueue_dma source(%arg0 : memref<2x8x32xf32, #tpu.memory_space<any>>) target(%arg1 : memref<2x8x32xf32, #tpu.memory_space<any>>) target_semaphore(%arg2 : memref<!tpu.dma_semaphore, #tpu.memory_space<semaphore_mem>>)
    tpu.wait_dma2 semaphore(%arg2 : memref<!tpu.dma_semaphore, #tpu.memory_space<semaphore_mem>>) src(%arg0 : memref<2x8x32xf32, #tpu.memory_space<any>>) dst(%arg1 : memref<2x8x32xf32, #tpu.memory_space<any>>)
    return
  }
}

</mosaic_0001>

<bundles_post_ra>
// kernel: tpu_custom_call.1
= control target key start
LH: loop header
LB: loop body
LE: loop exit
PB: predicated region body
PF: predicated region fallthrough
CT: control target
= control target key end

     0   :  { %s29_s6 = smov [#allocation2]   ;;  %s30_s7 = smov 131072   ;;  %s48_s0 = inlined_call_operand.hbm [shape: f32[2,8,32], index: 0, kind: input, shape index: {}]   ;;  %s49_s1 = inlined_call_operand.hbm [shape: f32[2,8,32], index: 1, kind: output, shape index: {}]  }
   0x1   :  { %s31_s8 = smov 0  }
   0x2   :  { %12 = dma.general %s48_s0, 256, %s49_s1, %s29_s6, %s30_s7, [#allocation4], %s31_s8, 0  }
   0x3   :  { %27 = dma.done.wait [#allocation2], 256 }
   0x4   :  { %28 = vsyncadd [#allocation2], 4294967040 }
   0x5   :  { %17 = vsyncmov [#allocation2] }
   0x8   :  { %s18_s13 = vpop.sfrf %17 }
   0x9   :  { %p23_p0 = scmp.ne.s32.totalorder %s18_s13, 0 }
   0xb   :  { %22 = shalt.err (%p23_p0)  }

</bundles_post_ra>
